<compile_context>
chip_gen: v6e
topology: v6e:2x2x1
jax: 0.10.0
libtpu: 0.0.40
codegen_flags: <defaults>
</compile_context>

<pallas_src>
import math

import jax
import jax.numpy as jnp
from jax.experimental import pallas as pl
from jax.experimental.pallas import tpu as pltpu


def _drop_path_kernel(scale_ref, x_ref, o_ref):
    # (TB, 1) per-sample scale broadcast against the (TB, TM) activation tile.
    # Widening multiply (e.g. bf16 x f32 -> f32), then cast back to out dtype.
    o_ref[...] = (x_ref[...] * scale_ref[...]).astype(o_ref.dtype)


def _choose_tiles(B, M, dtype_bytes):
    """Pick (TB, TM) block shape for the (B, M) activation view."""
    # Native sublane packing: one vreg holds 8 f32 / 16 bf16 / 32 int8 rows.
    packing = {1: 32, 2: 16}.get(dtype_bytes, 8)
    per_buffer_budget = 6 * 1024 * 1024  # bytes; x4 (double-buffered in + out)

    tb0 = B if B < packing else packing
    row_bytes = max(1, M * dtype_bytes)

    if tb0 * row_bytes <= per_buffer_budget:
        # Full feature rows fit: one contiguous DMA per block; grow the batch
        # tile (in multiples of the packing factor) instead of splitting M.
        TM = M
        max_tb = per_buffer_budget // row_bytes
        max_tb = max(tb0, (max_tb // packing) * packing)
        TB = B if B <= max_tb else max_tb
    else:
        # Feature rows are huge: tile the feature axis in multiples of 128.
        TB = tb0
        tm_cap = (per_buffer_budget // (TB * dtype_bytes)) // 128 * 128
        TM = max(128, tm_cap)

    # v7x megacore: guarantee >= 2 grid steps along a "parallel" axis for
    # mid/large tensors so both TensorCores get work (skip for tiny inputs
    # where per-step overhead would dominate).
    total_bytes = B * M * dtype_bytes
    if (pl.cdiv(B, TB) * pl.cdiv(M, TM) == 1
            and total_bytes >= (1 << 20)
            and M > 128):
        TM = max(128, ((pl.cdiv(M, 2) + 127) // 128) * 128)

    return TB, TM


def drop_path_pallas(x, key, drop_prob=0.0, training=False, scale_by_keep=True):
    """Pallas implementation of timm-style drop_path (per-sample stochastic depth)."""
    if drop_prob == 0.0 or not training:
        return x
    keep_prob = 1.0 - drop_prob

    orig_shape = x.shape
    B = x.shape[0]
    M = int(math.prod(x.shape[1:])) if x.ndim > 1 else 1

    # Per-sample Bernoulli(keep_prob) mask (threefry), optionally scaled by
    # 1/keep_prob -- matches the PyTorch reference which broadcasts a
    # (B, 1, ..., 1) random tensor over each whole sample.
    keep = jax.random.bernoulli(key, p=keep_prob, shape=(B,)).astype(jnp.float32)
    if keep_prob > 0.0 and scale_by_keep:
        keep = keep / keep_prob
    scale2 = keep.reshape(B, 1)

    # Lane-dense 2D view; no pad / no trailing slice (boundary blocks handle
    # the ragged edge -- safe because the op is purely elementwise).
    x2 = x.reshape(B, M)
    dtype_bytes = jnp.dtype(x.dtype).itemsize

    TB, TM = _choose_tiles(B, M, dtype_bytes)
    grid = (pl.cdiv(B, TB), pl.cdiv(M, TM))

    out = pl.pallas_call(
        _drop_path_kernel,
        out_shape=jax.ShapeDtypeStruct((B, M), x.dtype),
        grid=grid,
        in_specs=[
            pl.BlockSpec((TB, 1), lambda i, j: (i, 0)),    # per-sample scale
            pl.BlockSpec((TB, TM), lambda i, j: (i, j)),   # activation tile
        ],
        out_specs=pl.BlockSpec((TB, TM), lambda i, j: (i, j)),
        compiler_params=pltpu.CompilerParams(
            # No in-kernel state -> both grid axes are embarrassingly parallel
            # (lets v7x shard across its 2 TensorCores; neutral on v5e/v6e).
            dimension_semantics=("parallel", "parallel"),
            # Explicit scoped-VMEM budget: >= every gen's default, < v7x's
            # 64 MiB physical; 4 x 6 MiB double-buffered blocks fit easily.
            vmem_limit_bytes=32 * 1024 * 1024,
        ),
        cost_estimate=pl.CostEstimate(
            flops=B * M,
            transcendentals=0,
            bytes_accessed=2 * B * M * dtype_bytes + B * 4,
        ),
    )(scale2, x2)

    return out.reshape(orig_shape)


class DropPath:
    """JAX/Pallas counterpart of the PyTorch DropPath module."""

    def __init__(self, drop_prob: float = 0.0, scale_by_keep: bool = True):
        self.drop_prob = drop_prob
        self.scale_by_keep = scale_by_keep
        self.training = True

    def __call__(self, x, seed=0):
        # NOTE: callers must thread a fresh seed/key per training step; reusing
        # the same seed reuses the identical drop mask.
        key = jax.random.PRNGKey(seed)
        return drop_path_pallas(
            x, key, self.drop_prob, self.training, self.scale_by_keep
        )


if __name__ == "__main__":
    key = jax.random.PRNGKey(0)
    B, N, D = 2, 8, 32
    x = jax.random.normal(key, (B, N, D), dtype=jnp.float32)

    drop_prob = 0.25
    mod = DropPath(drop_prob=drop_prob, scale_by_keep=True)
    mod.training = True

    out = jax.block_until_ready(mod(x, seed=1234))

    # Sanity checks: each sample is either all-zero or x / keep_prob.
    keep_prob = 1.0 - drop_prob
    for b in range(B):
        dropped = bool(jnp.allclose(out[b], 0.0))
        kept = bool(jnp.allclose(out[b], x[b] / keep_prob, atol=1e-5))
        assert dropped or kept, f"sample {b}: not a valid per-sample drop-path output"

    # Eval / drop_prob=0 paths are identity.
    mod.training = False
    out_eval = jax.block_until_ready(mod(x, seed=1234))
    assert jnp.array_equal(out_eval, x)
    mod.training = True
    mod.drop_prob = 0.0
    out_p0 = jax.block_until_ready(mod(x, seed=1234))
    assert jnp.array_equal(out_p0, x)

    # Exercise a ragged feature dim (M % 128 != 0) to hit the boundary-block path.
    x_ragged = jax.random.normal(jax.random.PRNGKey(1), (3, 5, 50), dtype=jnp.float32)
    mod2 = DropPath(drop_prob=0.5, scale_by_keep=True)
    out_r = jax.block_until_ready(mod2(x_ragged, seed=7))
    for b in range(3):
        dropped = bool(jnp.allclose(out_r[b], 0.0))
        kept = bool(jnp.allclose(out_r[b], x_ragged[b] / 0.5, atol=1e-5))
        assert dropped or kept, f"ragged sample {b}: invalid drop-path output"

    print("KERNEL_OK")
</pallas_src>

<mosaic_0001>
module attributes {stable_mosaic.version = 11 : i64} {
  func.func @_drop_path_kernel(%arg0: i32, %arg1: i32, %arg2: memref<2x1xf32, #tpu.memory_space<vmem>>, %arg3: memref<2x256xf32, #tpu.memory_space<vmem>>, %arg4: memref<2x256xf32, #tpu.memory_space<vmem>>) attributes {dimension_semantics = [#tpu.dimension_semantics<parallel>, #tpu.dimension_semantics<parallel>], iteration_bounds = array<i64: 1, 1>, scalar_prefetch = 0 : i64, scratch_operands = 0 : i64, tpu.core_type = #tpu.core_type<tc>, window_params = [{transform_indices = @transform_0, window_bounds = array<i64: 2, 1>}, {transform_indices = @transform_1, window_bounds = array<i64: 2, 256>}, {transform_indices = @transform_2, window_bounds = array<i64: 2, 256>}]} {
    %c0 = arith.constant 0 : index
    %c0_0 = arith.constant 0 : index
    %0 = vector.load %arg3[%c0, %c0_0] : memref<2x256xf32, #tpu.memory_space<vmem>>, vector<2x256xf32>
    %c0_1 = arith.constant 0 : index
    %c0_2 = arith.constant 0 : index
    %1 = vector.load %arg2[%c0_1, %c0_2] : memref<2x1xf32, #tpu.memory_space<vmem>>, vector<2x1xf32>
    %2 = vector.broadcast %1 : vector<2x1xf32> to vector<2x256xf32>
    %3 = arith.mulf %0, %2 : vector<2x256xf32>
    %c0_3 = arith.constant 0 : index
    %c0_4 = arith.constant 0 : index
    %4 = vector.load %arg4[%c0_3, %c0_4] : memref<2x256xf32, #tpu.memory_space<vmem>>, vector<2x256xf32>
    tpu.vector_store %arg4[%c0_3, %c0_4], %3 {strides = array<i32>} : memref<2x256xf32, #tpu.memory_space<vmem>>, vector<2x256xf32>,
    return
  }
  func.func @transform_0(%arg0: i32, %arg1: i32) -> (i32, i32) {
    %c0_i32 = arith.constant 0 : i32
    %c0_i32_0 = arith.constant 0 : i32
    return %arg0, %c0_i32 : i32, i32
  }
  func.func @transform_1(%arg0: i32, %arg1: i32) -> (i32, i32) {
    %c0_i32 = arith.constant 0 : i32
    return %arg0, %arg1 : i32, i32
  }
  func.func @transform_2(%arg0: i32, %arg1: i32) -> (i32, i32) {
    %c0_i32 = arith.constant 0 : i32
    return %arg0, %arg1 : i32, i32
  }
}

</mosaic_0001>

<bundles_post_ra>
// kernel: tpu_custom_call.1
= control target key start
LH: loop header
LB: loop body
LE: loop exit
PB: predicated region body
PF: predicated region fallthrough
CT: control target
= control target key end

     0   :  { %v68_v1 = vmov 0   ;;  %s95_s0 = inlined_call_operand.vmem [shape: f32[2,1], index: 0, kind: input, shape index: {}]   ;;  %s96_s1 = inlined_call_operand.vmem [shape: f32[2,256], index: 1, kind: input, shape index: {}]   ;;  %s97_s2 = inlined_call_operand.hbm [shape: f32[2,256], index: 2, kind: output, shape index: {}]  }
   0x1   :  { %v13_v0 = vld [vmem:[%s95_s0] sm:$0x3]  ;;  %45 = vset.pattern.permute.xlu0 %v68_v1 }
   0x2   :  { %7 = vsyncpa [#allocation3], 0  ;;  %16 = vperm.xlu0 %45, %v13_v0   ;;  %v69_v2 = vmov 269488144   ;;  %v21_v4 = vlaneseq  ;;  %v12_v9 = vld [vmem:[%s96_s1] sm:$0xf] }
   0x3   :  { %v19_v3 = vunpack.c.l.s4 %v69_v2  ;;  %s70_s13 = smov [#allocation2]  }
   0x4   :  { %v22_v6 = vshrl.u32 %v21_v4, 7  ;;  %s34_s14 = sshll.u32 %s70_s13, 4  ;;  %s35_s14 = int_to_ptr.vmem [resolvable:$true] %s34_s14 }
   0x5   :  { %v20_v5 = vunpack.c.0.s8 %v19_v3  ;;  %s46_s0 = scalar_lea.vmem %s35_s14, 64  ;;  %p51_p1 = scmp.lt.s32.totalorder %s35_s14, %s35_s14 }
   0x6   :  { %p47_p0 = scmp.ne.s32.totalorder %s35_s14, %s46_s0  ;;  %p52_p2 = scmp.lt.s32.totalorder %s46_s0, %s46_s0 }
   0x7   :  { %v23_v7 = vsub.s32 %v20_v5, %v22_v6 }
   0x8   :  { %p53_p3 = por %p52_p2, %p51_p1 }
   0xa   :  { %p54_p4 = pnand %p53_p3, %p47_p0 }
  0x7d   :  { %v17_v8 = vpop.permute.xlu0 %16 }
  0x7e   :  { %v24_v10 = vrot.slane %v17_v8, %v23_v7 }
  0x80   :  { %v26_v11 = vmul.f32 %v24_v10, %v12_v9 }
  0x82   :  { %27 = vst [vmem:[#allocation2] sm:$0xf] %v26_v11 }
  0x83   :  { %57 = shalt.err (!%p54_p4)
}
  0x84   :  { %37 = dma.vmem_to_hbm [thread:$0]  %s35_s14, 64, %s97_s2, [#allocation3]  }
  0x85   :  { %66 = dma.done.wait [#allocation3], 64  }
  0x86   :  { %67 = vsyncadd [#allocation3], 4294967232 }
  0x87   :  { %41 = vsyncpa [#allocation3], 1 }

</bundles_post_ra>
